<compile_context>
chip_gen: v7x
topology: tpu7x:2x2x1
jax: 0.10.0
libtpu: 0.0.40
codegen_flags: <defaults>
</compile_context>

<pallas_src>
import jax
import jax.numpy as jnp
from jax.experimental import pallas as pl
from jax.experimental.pallas import tpu as pltpu

LANE = 128     # TPU lane width
SUBLANE = 8    # TPU sublane width


def _round_up(x: int, m: int) -> int:
    return ((x + m - 1) // m) * m


def _domain_classifier_kernel(x_ref, w1_ref, b1_ref, w2_ref, b2_ref, o_ref):
    # fc1 on the MXU: bf16 inputs (cast in-kernel), f32 accumulation.
    x = x_ref[...].astype(jnp.bfloat16)
    h = jnp.dot(x, w1_ref[...], preferred_element_type=jnp.float32)
    # Bias add + ReLU in f32 (v5e VPU has no native bf16 elementwise).
    h = jnp.maximum(h + b1_ref[...], 0.0)
    # fc2 fully in f32 — free under the memory roofline, avoids re-quantizing h.
    out = jnp.dot(h, w2_ref[...], preferred_element_type=jnp.float32)
    n_out = o_ref.shape[-1]
    o_ref[...] = (out[:, :n_out] + b2_ref[...]).astype(o_ref.dtype)


def prepare_domain_classifier_params(w1, b1, w2, b2):
    """Pad/cast parameters once (hoisted out of the per-call hot path).

    w1: (D, H)  f32  (already transposed from PyTorch's (out, in))
    b1: (H,)    f32
    w2: (H, O)  f32
    b2: (O,)    f32
    """
    D, H = w1.shape
    O = w2.shape[1]
    Hp = _round_up(H, LANE)
    Op = _round_up(O, LANE)

    # fc1 weight in bf16 (MXU input dtype); hidden dim padded to a full lane
    # width. Padded hidden units get zero weight + zero bias -> ReLU(0)=0, and
    # the corresponding (padded) W2 rows are zero, so the math stays exact.
    w1p = jnp.zeros((D, Hp), jnp.bfloat16).at[:, :H].set(w1.astype(jnp.bfloat16))
    b1p = jnp.zeros((1, Hp), jnp.float32).at[0, :H].set(b1.astype(jnp.float32))
    # fc2 weight in f32, N padded to 128 so the MXU sees a full tile; the
    # kernel slices the first O columns before storing. b2 stays at true width.
    w2p = jnp.zeros((Hp, Op), jnp.float32).at[:H, :O].set(w2.astype(jnp.float32))
    b2p = b2.reshape(1, O).astype(jnp.float32)
    return (w1p, b1p, w2p, b2p, O)


def domain_classifier_forward(x, params):
    """Fused MLP forward matching nn.Linear(D,H) -> ReLU -> nn.Linear(H,2)."""
    w1p, b1p, w2p, b2p, O = params
    B, D = x.shape
    Hp = w1p.shape[1]
    Op = w2p.shape[1]

    # Batch tiling: large tiles to amortize per-step overhead, but >=2 grid
    # steps whenever the batch permits so v7x can use both TensorCores.
    B8 = _round_up(B, SUBLANE)
    if B8 >= 2 * SUBLANE:
        TB = min(2048, _round_up(-(-B8 // 2), SUBLANE))
    else:
        TB = B8
    Bp = _round_up(B8, TB)

    # Only the batch axis is (possibly) padded; x stays raw f32.
    xp = x if Bp == B else jnp.zeros((Bp, D), x.dtype).at[:B].set(x)

    grid = (Bp // TB,)

    out = pl.pallas_call(
        _domain_classifier_kernel,
        out_shape=jax.ShapeDtypeStruct((Bp, O), jnp.float32),
        grid_spec=pltpu.PrefetchScalarGridSpec(
            num_scalar_prefetch=0,
            grid=grid,
            in_specs=[
                pl.BlockSpec((TB, D), lambda i: (i, 0)),    # x streams, raw f32
                pl.BlockSpec((D, Hp), lambda i: (0, 0)),    # W1 resident
                pl.BlockSpec((1, Hp), lambda i: (0, 0)),    # b1 resident
                pl.BlockSpec((Hp, Op), lambda i: (0, 0)),   # W2 resident
                pl.BlockSpec((1, O), lambda i: (0, 0)),     # b2 resident
            ],
            out_specs=pl.BlockSpec((TB, O), lambda i: (i, 0)),
        ),
        compiler_params=pltpu.CompilerParams(
            dimension_semantics=("parallel",),
        ),
    )(xp, w1p, b1p, w2p, b2p)

    return out if Bp == B else out[:B]


def reference_forward(x, w1, b1, w2, b2):
    h = jnp.maximum(x @ w1 + b1, 0.0)
    return h @ w2 + b2


if __name__ == "__main__":
    # Small shapes consistent with the module: batch=8, input_dim=32, hidden_dim=32.
    B, input_dim, hidden_dim, out_dim = 8, 32, 32, 2

    key = jax.random.PRNGKey(0)
    kx, kw1, kb1, kw2, kb2 = jax.random.split(key, 5)

    x = jax.random.normal(kx, (B, input_dim), dtype=jnp.float32)

    # Deterministic init mimicking nn.Linear's uniform(-1/sqrt(fan_in), 1/sqrt(fan_in)).
    bound1 = 1.0 / (input_dim ** 0.5)
    w1 = jax.random.uniform(kw1, (input_dim, hidden_dim), jnp.float32, -bound1, bound1)
    b1 = jax.random.uniform(kb1, (hidden_dim,), jnp.float32, -bound1, bound1)

    bound2 = 1.0 / (hidden_dim ** 0.5)
    w2 = jax.random.uniform(kw2, (hidden_dim, out_dim), jnp.float32, -bound2, bound2)
    b2 = jax.random.uniform(kb2, (out_dim,), jnp.float32, -bound2, bound2)

    # Parameter padding/cast is hoisted out of the hot path.
    params = prepare_domain_classifier_params(w1, b1, w2, b2)

    out = domain_classifier_forward(x, params)
    out = jax.block_until_ready(out)

    ref = reference_forward(x, w1, b1, w2, b2)
    assert out.shape == (B, out_dim)
    # bf16 MXU inputs on fc1 (f32 accumulation, f32 fc2) -> slightly loosened tolerance.
    assert jnp.allclose(out, ref, atol=2e-2, rtol=2e-2), "mismatch vs reference"

    print("KERNEL_OK")
</pallas_src>

<mosaic_0001>
module attributes {stable_mosaic.version = 11 : i64} {
  func.func @_domain_classifier_kernel(%arg0: i32, %arg1: memref<8x32xf32, #tpu.memory_space<vmem>>, %arg2: memref<32x128xbf16, #tpu.memory_space<vmem>>, %arg3: memref<1x128xf32, #tpu.memory_space<vmem>>, %arg4: memref<128x128xf32, #tpu.memory_space<vmem>>, %arg5: memref<1x2xf32, #tpu.memory_space<vmem>>, %arg6: memref<8x2xf32, #tpu.memory_space<vmem>>) attributes {dimension_semantics = [#tpu.dimension_semantics<parallel>], iteration_bounds = array<i64: 1>, scalar_prefetch = 0 : i64, scratch_operands = 0 : i64, tpu.core_type = #tpu.core_type<tc>, window_params = [{transform_indices = @transform_0, window_bounds = array<i64: 8, 32>}, {pipeline_mode = #tpu.pipeline_mode<synchronous>, transform_indices = @transform_1, window_bounds = array<i64: 32, 128>}, {pipeline_mode = #tpu.pipeline_mode<synchronous>, transform_indices = @transform_2, window_bounds = array<i64: 1, 128>}, {pipeline_mode = #tpu.pipeline_mode<synchronous>, transform_indices = @transform_3, window_bounds = array<i64: 128, 128>}, {pipeline_mode = #tpu.pipeline_mode<synchronous>, transform_indices = @transform_4, window_bounds = array<i64: 1, 2>}, {transform_indices = @transform_5, window_bounds = array<i64: 8, 2>}]} {
    %c0 = arith.constant 0 : index
    %c0_0 = arith.constant 0 : index
    %0 = vector.load %arg1[%c0, %c0_0] : memref<8x32xf32, #tpu.memory_space<vmem>>, vector<8x32xf32>
    %1 = arith.truncf %0 : vector<8x32xf32> to vector<8x32xbf16>
    %c0_1 = arith.constant 0 : index
    %c0_2 = arith.constant 0 : index
    %2 = vector.load %arg2[%c0_1, %c0_2] : memref<32x128xbf16, #tpu.memory_space<vmem>>, vector<32x128xbf16>
    %cst = arith.constant dense<0.000000e+00> : vector<8x128xf32>
    %3 = tpu.matmul %1, %2, %cst {dimension_numbers = #tpu.dot_dimension_numbers<[1], [0], [0], [1], [0, 0, 1, 1], [], []>} : vector<8x32xbf16>, vector<32x128xbf16>, vector<8x128xf32> -> vector<8x128xf32>
    %c0_3 = arith.constant 0 : index
    %c0_4 = arith.constant 0 : index
    %4 = vector.load %arg3[%c0_3, %c0_4] : memref<1x128xf32, #tpu.memory_space<vmem>>, vector<1x128xf32>
    %5 = vector.broadcast %4 : vector<1x128xf32> to vector<8x128xf32>
    %6 = arith.addf %3, %5 : vector<8x128xf32>
    %cst_5 = arith.constant 0.000000e+00 : f32
    %7 = vector.broadcast %cst_5 : f32 to vector<8x128xf32>
    %8 = arith.maximumf %6, %7 : vector<8x128xf32>
    %c0_6 = arith.constant 0 : index
    %c0_7 = arith.constant 0 : index
    %9 = vector.load %arg4[%c0_6, %c0_7] : memref<128x128xf32, #tpu.memory_space<vmem>>, vector<128x128xf32>
    %cst_8 = arith.constant dense<0.000000e+00> : vector<8x128xf32>
    %10 = tpu.matmul %8, %9, %cst_8 {dimension_numbers = #tpu.dot_dimension_numbers<[1], [0], [0], [1], [0, 0, 1, 1], [], []>} : vector<8x128xf32>, vector<128x128xf32>, vector<8x128xf32> -> vector<8x128xf32>
    %11 = vector.extract_strided_slice %10 {offsets = [0, 0], sizes = [8, 2], strides = [1, 1]} : vector<8x128xf32> to vector<8x2xf32>
    %c0_9 = arith.constant 0 : index
    %c0_10 = arith.constant 0 : index
    %12 = vector.load %arg5[%c0_9, %c0_10] : memref<1x2xf32, #tpu.memory_space<vmem>>, vector<1x2xf32>
    %13 = vector.broadcast %12 : vector<1x2xf32> to vector<8x2xf32>
    %14 = arith.addf %11, %13 : vector<8x2xf32>
    %c0_11 = arith.constant 0 : index
    %c0_12 = arith.constant 0 : index
    %15 = vector.load %arg6[%c0_11, %c0_12] : memref<8x2xf32, #tpu.memory_space<vmem>>, vector<8x2xf32>
    tpu.vector_store %arg6[%c0_11, %c0_12], %14 {strides = array<i32>} : memref<8x2xf32, #tpu.memory_space<vmem>>, vector<8x2xf32>,
    return
  }
  func.func @transform_0(%arg0: i32) -> (i32, i32) {
    %c0_i32 = arith.constant 0 : i32
    %c0_i32_0 = arith.constant 0 : i32
    return %arg0, %c0_i32 : i32, i32
  }
  func.func @transform_1(%arg0: i32) -> (i32, i32) {
    %c0_i32 = arith.constant 0 : i32
    %c0_i32_0 = arith.constant 0 : i32
    %c0_i32_1 = arith.constant 0 : i32
    return %c0_i32, %c0_i32_0 : i32, i32
  }
  func.func @transform_2(%arg0: i32) -> (i32, i32) {
    %c0_i32 = arith.constant 0 : i32
    %c0_i32_0 = arith.constant 0 : i32
    %c0_i32_1 = arith.constant 0 : i32
    return %c0_i32, %c0_i32_0 : i32, i32
  }
  func.func @transform_3(%arg0: i32) -> (i32, i32) {
    %c0_i32 = arith.constant 0 : i32
    %c0_i32_0 = arith.constant 0 : i32
    %c0_i32_1 = arith.constant 0 : i32
    return %c0_i32, %c0_i32_0 : i32, i32
  }
  func.func @transform_4(%arg0: i32) -> (i32, i32) {
    %c0_i32 = arith.constant 0 : i32
    %c0_i32_0 = arith.constant 0 : i32
    %c0_i32_1 = arith.constant 0 : i32
    return %c0_i32, %c0_i32_0 : i32, i32
  }
  func.func @transform_5(%arg0: i32) -> (i32, i32) {
    %c0_i32 = arith.constant 0 : i32
    %c0_i32_0 = arith.constant 0 : i32
    return %arg0, %c0_i32 : i32, i32
  }
}

</mosaic_0001>

<bundles_post_ra>
// kernel: tpu_custom_call.1
= control target key start
LH: loop header
LB: loop body
LE: loop exit
PB: predicated region body
PF: predicated region fallthrough
CT: control target
= control target key end

     0   :  { %10 = vsyncpa [#allocation3], 0  ;;  %s491_s0 = inlined_call_operand.hbm [shape: f32[8,32], index: 0, kind: input, shape index: {}]   ;;  %s492_s1 = inlined_call_operand.hbm [shape: bf16[32,128], index: 1, kind: input, shape index: {}]   ;;  %s493_s2 = inlined_call_operand.vmem [shape: f32[1,128], index: 2, kind: input, shape index: {}]   ;;  %s494_s3 = inlined_call_operand.hbm [shape: f32[128,128], index: 3, kind: input, shape index: {}]   ;;  %s495_s4 = inlined_call_operand.vmem [shape: f32[1,2], index: 4, kind: input, shape index: {}]   ;;  %s496_s5 = inlined_call_operand.vmem [shape: f32[8,2], index: 5, kind: output, shape index: {}]  }
   0x1   :  { %11 = vsyncpa [#allocation5], 0  ;;  %s406_s18 = smov [#allocation4]   ;;  %s336_s22 = scalar_lea.hbm %s492_s1, 256 }
   0x2   :  { %s27_s19 = sshll.u32 %s406_s18, 4  ;;  %p337_p0 = scmp.ne.s32.totalorder %s492_s1, %s336_s22  ;;  %s28_s19 = int_to_ptr.vmem [resolvable:$true] %s27_s19 }
   0x3   :  { %p340_p1 = scmp.lt.u32.totalorder %s336_s22, %s492_s1 }
   0x5   :  { %p342_p2 = pnand %p340_p1, %p337_p0 }
   0x7   :  { %345 = shalt.err (!%p342_p2)
}
   0x8   :  { %s346_s27 = scalar_lea.vmem %s28_s19, 256  ;;  %p351_p4 = scmp.lt.s32.totalorder %s28_s19, %s28_s19 }
   0x9   :  { %p347_p3 = scmp.ne.s32.totalorder %s28_s19, %s346_s27  ;;  %p352_p5 = scmp.lt.s32.totalorder %s346_s27, %s346_s27 }
   0xb   :  { %p353_p6 = por %p352_p5, %p351_p4 }
   0xd   :  { %p354_p7 = pnand %p353_p6, %p347_p3 }
   0xf   :  { %357 = shalt.err (!%p354_p7)
}
  0x10   :  { %s407_s28 = smov 64   ;;  %s408_s29 = smov 4  }
  0x11   :  { %33 = dma.hbm_to_vmem [thread:$0]  %s492_s1, 256, %s28_s19, [#allocation5], %s407_s28, %s407_s28, %s408_s29  }
  0x12   :  { %s409_s7 = smov [#allocation2]   ;;  %s410_s9 = smov [#allocation6]  }
  0x13   :  { %s18_s8 = sshll.u32 %s409_s7, 4  ;;  %s41_s10 = sshll.u32 %s410_s9, 4  ;;  %s19_s8 = int_to_ptr.vmem [resolvable:$true] %s18_s8  ;;  %s42_s10 = int_to_ptr.vmem [resolvable:$true] %s41_s10 }
  0x14   :  { %s358_s13 = scalar_lea.hbm %s491_s0, 128 }
  0x15   :  { %p359_p8 = scmp.ne.s32.totalorder %s491_s0, %s358_s13  ;;  %p362_p9 = scmp.lt.u32.totalorder %s358_s13, %s491_s0 }
  0x17   :  { %p364_p10 = pnand %p362_p9, %p359_p8 }
  0x19   :  { %367 = shalt.err (!%p364_p10)
}
  0x1a   :  { %s368_s1 = scalar_lea.vmem %s19_s8, 128  ;;  %p373_p12 = scmp.lt.s32.totalorder %s19_s8, %s19_s8 }
  0x1b   :  { %p369_p11 = scmp.ne.s32.totalorder %s19_s8, %s368_s1  ;;  %p374_p13 = scmp.lt.s32.totalorder %s368_s1, %s368_s1 }
  0x1d   :  { %p375_p0 = por %p374_p13, %p373_p12 }
  0x1f   :  { %p376_p1 = pnand %p375_p0, %p369_p11 }
  0x21   :  { %379 = shalt.err (!%p376_p1)
}
  0x22   :  { %21 = dma.hbm_to_vmem [thread:$0]  %s491_s0, 128, %s19_s8, [#allocation3]  }
  0x23   :  { %s380_s22 = scalar_lea.hbm %s494_s3, 2048 }
  0x24   :  { %p381_p2 = scmp.ne.s32.totalorder %s494_s3, %s380_s22  ;;  %p384_p3 = scmp.lt.u32.totalorder %s380_s22, %s494_s3 }
  0x26   :  { %p386_p4 = pnand %p384_p3, %p381_p2 }
  0x28   :  { %389 = shalt.err (!%p386_p4)
}
  0x29   :  { %s390_s27 = scalar_lea.vmem %s42_s10, 2048  ;;  %p395_p6 = scmp.lt.s32.totalorder %s42_s10, %s42_s10 }
  0x2a   :  { %p391_p5 = scmp.ne.s32.totalorder %s42_s10, %s390_s27  ;;  %p396_p7 = scmp.lt.s32.totalorder %s390_s27, %s390_s27 }
  0x2c   :  { %p397_p8 = por %p396_p7, %p395_p6 }
  0x2e   :  { %p398_p9 = pnand %p397_p8, %p391_p5 }
  0x30   :  { %401 = shalt.err (!%p398_p9)
}
  0x31   :  { %s411_s0 = smov 128   ;;  %s412_s28 = smov 8  }
  0x32   :  { %47 = dma.hbm_to_vmem [thread:$0]  %s494_s3, 2048, %s42_s10, [#allocation5], %s411_s0, %s411_s0, %s412_s28  }
  0x33   :  { %402 = dma.done.wait [#allocation3], 128  }
  0x34   :  { %403 = vsyncadd [#allocation3], 4294967168 }
  0x35   :  { %404 = dma.done.wait [#allocation5], 2304  }
  0x36   :  { %405 = vsyncadd [#allocation5], 4294964992  ;;  %v413_v0 = vmov 0.0   ;;  %vm414_vm0 = vmmov 0   ;;  %v415_v1 = vmov 0.0|0.0   ;;  %v334_v2 = vld [vmem:[#allocation4] sm:$0xff]  }
  0x37   :  { %257 = vmatprep.subr.bf16.mxu0 %v413_v0  ;;  %261 = vmatprep.mubr.msk.bf16.mxu0 %vm414_vm0, %v413_v0  ;;  %v335_v3 = vld [vmem:[#allocation4 + $0x8] sm:$0xff]   ;;  %v60_v4 = vld [vmem:[#allocation2] sm:$0xff]  ;;  %v130_v5 = vld [vmem:[#allocation6] sm:$0xff]  ;;  %vm85_vm1 = vcmask 261120   ;;  %vm224_vm2 = vcmask 15360  }
  0x38   :  { %300 = vmatprep.subr.bf16.mxu1 %v415_v1  ;;  %297 = vmatprep.mubr.msk.f32.mxu1 %vm414_vm0, %v413_v0  ;;  %v131_v6 = vld [vmem:[#allocation6 + $0x8] sm:$0xff]  ;;  %v132_v8 = vld [vmem:[#allocation6 + $0x10] sm:$0xff]  ;;  %v133_v9 = vld [vmem:[#allocation6 + $0x18] sm:$0xff]  ;;  %v61_v10 = vpack.c.bf16 %v60_v4, %v60_v4 }
  0x39   :  { %258 = vmatpush3.bf16.msra.mxu0 %v334_v2  ;;  %v301_v7 = vpack.c.bf16 %v131_v6, %v130_v5  ;;  %v304_v11 = vpack.c.bf16 %v133_v9, %v132_v8  ;;  %v134_v12 = vld [vmem:[#allocation6 + $0x20] sm:$0xff]  ;;  %v135_v13 = vld [vmem:[#allocation6 + $0x28] sm:$0xff]  ;;  %v136_v15 = vld [vmem:[#allocation6 + $0x30] sm:$0xff] }
  0x3a   :  { %259 = vmatprep.subr.bf16.mxu0 %v413_v0  ;;  %v307_v14 = vpack.c.bf16 %v135_v13, %v134_v12  ;;  %v137_v16 = vld [vmem:[#allocation6 + $0x38] sm:$0xff]  ;;  %v138_v18 = vld [vmem:[#allocation6 + $0x40] sm:$0xff]  ;;  %v139_v19 = vld [vmem:[#allocation6 + $0x48] sm:$0xff] }
  0x3b   :  { %302 = vmatpush3.bf16.msra.mxu1 %v301_v7  ;;  %v310_v17 = vpack.c.bf16 %v137_v16, %v136_v15  ;;  %v313_v20 = vpack.c.bf16 %v139_v19, %v138_v18  ;;  %v140_v21 = vld [vmem:[#allocation6 + $0x50] sm:$0xff]  ;;  %v141_v22 = vld [vmem:[#allocation6 + $0x58] sm:$0xff]  ;;  %v142_v24 = vld [vmem:[#allocation6 + $0x60] sm:$0xff] }
  0x3c   :  { %303 = vmatprep.subr.bf16.mxu1 %v415_v1  ;;  %v316_v23 = vpack.c.bf16 %v141_v22, %v140_v21  ;;  %v143_v25 = vld [vmem:[#allocation6 + $0x68] sm:$0xff]  ;;  %v144_v27 = vld [vmem:[#allocation6 + $0x70] sm:$0xff]  ;;  %v145_v28 = vld [vmem:[#allocation6 + $0x78] sm:$0xff] }
  0x3d   :  { %260 = vmatpush3.bf16.msra.mxu0 %v335_v3  ;;  %v319_v26 = vpack.c.bf16 %v143_v25, %v142_v24  ;;  %v322_v29 = vpack.c.bf16 %v145_v28, %v144_v27  ;;  %v232_v30 = vld [vmem:[%s493_s2] ss:$0 sm:$0xff] }
  0x3e   :  { %v236_v37 = vld [vmem:[%s495_s4] ss:$0 sm:$0xff] }
  0x3f   :  { %305 = vmatpush3.bf16.msra.mxu1 %v304_v11 }
  0x40   :  { %262 = vmatmul.mubr.msk.bf16.vlgmr.msra.gmra.mrb[0].mxu0 %vm85_vm1, %v61_v10  ;;  %306 = vmatprep.subr.bf16.mxu1 %v415_v1 }
  0x43   :  { %308 = vmatpush3.bf16.msra.mxu1 %v307_v14 }
  0x44   :  { %309 = vmatprep.subr.bf16.mxu1 %v415_v1 }
  0x47   :  { %311 = vmatpush3.bf16.msra.mxu1 %v310_v17 }
  0x48   :  { %312 = vmatprep.subr.bf16.mxu1 %v415_v1 }
  0x4b   :  { %314 = vmatpush3.bf16.msra.mxu1 %v313_v20 }
  0x4c   :  { %315 = vmatprep.subr.bf16.mxu1 %v415_v1 }
  0x4f   :  { %317 = vmatpush3.bf16.msra.mxu1 %v316_v23 }
  0x50   :  { %318 = vmatprep.subr.bf16.mxu1 %v415_v1 }
  0x53   :  { %320 = vmatpush3.bf16.msra.mxu1 %v319_v26 }
  0x54   :  { %321 = vmatprep.subr.bf16.mxu1 %v415_v1 }
  0x57   :  { %323 = vmatpush3.bf16.msra.mxu1 %v322_v29 }
 0x113   :  { %v123_v31 = vpop.f32.mrb[0].mxu0 }
 0x114   :  { %v124_v32 = vadd.f32 %v232_v30, %v123_v31  ;;  %v263_v33 = vpop.f32.mrb[1].mxu0 }
 0x115   :  { %v126_v34 = vpop.f32.mrb[2].mxu0 }
 0x116   :  { %v129_v35 = vmax.f32 %v124_v32, 0.0  ;;  %v264_v36 = vpop.f32.mrb[3].mxu0 }
 0x118   :  { %298 = vmatmul.mubr.f32.vlgmr.msra.gmra.mrb[0].mxu1 %v129_v35 }
 0x1eb   :  { %v212_v38 = vpop.f32.mrb[0].mxu1 }
 0x1ec   :  { %v223_v39 = vadd.f32 %v236_v37, %v212_v38  ;;  %v299_v40 = vpop.f32.mrb[1].mxu1 }
 0x1ee   :  { %225 = vst.msk [vmem:[%s496_s5] sm:$0xff] %vm224_vm2, %v223_v39 }
 0x1ef   :  { %230 = vsyncpa [#allocation3], 1 }
 0x1f0   :  { %231 = vsyncpa [#allocation5], 1 }

</bundles_post_ra>
